<compile_context>
chip_gen: v7x
topology: tpu7x:2x2x1
jax: 0.10.0
libtpu: 0.0.40
codegen_flags: <defaults>
</compile_context>

<pallas_src>
import functools

import jax
import jax.numpy as jnp
from jax import lax
from jax.experimental import pallas as pl
from jax.experimental.pallas import tpu as pltpu


def _round_up(x, m):
    return (x + m - 1) // m * m


def _additive_attn_kernel(q_ref, k_ref, v_ref, o_ref, m_sc, l_sc, acc_sc, *,
                          scale, lk_total, mask_keys, d_chunk, n_d_chunks):
    ki = pl.program_id(2)
    nk = pl.num_programs(2)
    tq, _ = q_ref.shape
    tk, _ = k_ref.shape

    @pl.when(ki == 0)
    def _init():
        m_sc[...] = jnp.full(m_sc.shape, -1e30, dtype=m_sc.dtype)
        l_sc[...] = jnp.zeros(l_sc.shape, l_sc.dtype)
        acc_sc[...] = jnp.zeros(acc_sc.shape, acc_sc.dtype)

    # ---- additive scores, feature dim chunked into 128-lane slabs ----------
    # Live set per step: (tq, tk, d_chunk) tanh slab + a (tq, tk) f32
    # accumulator; the full (Lq, Lk, D) tensor never exists.
    def d_step(c, w):
        off = pl.multiple_of(c * d_chunk, d_chunk)
        qc = q_ref[:, pl.ds(off, d_chunk)]                 # (tq, Dc)
        kc = k_ref[:, pl.ds(off, d_chunk)]                 # (tk, Dc)
        t = jnp.tanh(qc[:, None, :] + kc[None, :, :])      # (tq, tk, Dc), input dtype
        return w + jnp.sum(t.astype(jnp.float32), axis=-1)

    w = lax.fori_loop(0, n_d_chunks, d_step,
                      jnp.zeros((tq, tk), jnp.float32), unroll=True)

    if scale != 1.0:                       # hoisted scale: one (tq, tk) multiply
        w = w * jnp.float32(scale)

    if mask_keys:                          # static: only emitted when Lk was padded
        col = ki * tk + lax.broadcasted_iota(jnp.int32, (tq, tk), 1)
        w = jnp.where(col < lk_total, w, jnp.float32(-1e30))

    # ---- online (flash-style) softmax, stats in f32 -------------------------
    m_prev = m_sc[...]                                         # (tq, 1)
    m_new = jnp.maximum(m_prev, jnp.max(w, axis=-1, keepdims=True))
    alpha = jnp.exp(m_prev - m_new)                            # (tq, 1)
    p = jnp.exp(w - m_new)                                     # (tq, tk)
    l_sc[...] = alpha * l_sc[...] + jnp.sum(p, axis=-1, keepdims=True)
    acc_sc[...] = alpha * acc_sc[...] + jnp.dot(
        p.astype(v_ref.dtype), v_ref[...], preferred_element_type=jnp.float32)
    m_sc[...] = m_new

    @pl.when(ki == nk - 1)
    def _finalize():
        l = l_sc[...]
        inv_l = pl.reciprocal(l, approx=True)
        inv_l = inv_l * (2.0 - l * inv_l)      # one Newton step -> ~f32 accuracy
        o_ref[...] = (acc_sc[...] * inv_l).astype(o_ref.dtype)


def additive_attention(q, k, v, scale=1.0, *, tq=None, tk=None, d_chunk=128):
    """Pallas additive attention.

    q: (B, Lq, D), k: (B, Lk, D), v: (B, Lk, Dv) -> (B, Lq, Dv)
    """
    B, Lq, D = q.shape
    Bk, Lk, Dk = k.shape
    Bv, Lkv, Dv = v.shape
    assert Bk == B and Bv == B and Dk == D and Lkv == Lk

    # Lane-dense padding of the feature dims; sublane padding of the sequence
    # dims. Padding D with zeros is exact (tanh(0) = 0); padded v columns are
    # zero and sliced off; padded keys are masked in-kernel; padded query rows
    # are sliced off.
    Dp = _round_up(D, 128)
    Dvp = _round_up(Dv, 128)
    tq = tq or min(128, _round_up(Lq, 8))
    tk = tk or min(128, _round_up(Lk, 8))
    Lqp = _round_up(Lq, tq)
    Lkp = _round_up(Lk, tk)
    d_chunk = min(d_chunk, Dp)
    assert Dp % d_chunk == 0
    n_d_chunks = Dp // d_chunk

    qp = jnp.pad(q, ((0, 0), (0, Lqp - Lq), (0, Dp - D))) if (Lqp, Dp) != (Lq, D) else q
    kp = jnp.pad(k, ((0, 0), (0, Lkp - Lk), (0, Dp - D))) if (Lkp, Dp) != (Lk, D) else k
    vp = jnp.pad(v, ((0, 0), (0, Lkp - Lk), (0, Dvp - Dv))) if (Lkp, Dvp) != (Lk, Dv) else v

    grid = (B, Lqp // tq, Lkp // tk)

    kernel = functools.partial(
        _additive_attn_kernel,
        scale=float(scale), lk_total=Lk, mask_keys=(Lkp != Lk),
        d_chunk=d_chunk, n_d_chunks=n_d_chunks)

    itemsize = jnp.dtype(q.dtype).itemsize
    cost = pl.CostEstimate(
        flops=2 * B * Lqp * Lkp * Dvp + 3 * B * Lqp * Lkp * Dp,
        transcendentals=B * Lqp * Lkp * Dp + 2 * B * Lqp * Lkp,
        bytes_accessed=int(itemsize * (qp.size + kp.size + vp.size + B * Lqp * Dvp)),
    )

    out = pl.pallas_call(
        kernel,
        out_shape=jax.ShapeDtypeStruct((B, Lqp, Dvp), q.dtype),
        grid_spec=pltpu.PrefetchScalarGridSpec(
            num_scalar_prefetch=0,
            grid=grid,
            in_specs=[
                pl.BlockSpec((None, tq, Dp), lambda b, qi, ki: (b, qi, 0)),
                pl.BlockSpec((None, tk, Dp), lambda b, qi, ki: (b, ki, 0)),
                pl.BlockSpec((None, tk, Dvp), lambda b, qi, ki: (b, ki, 0)),
            ],
            out_specs=pl.BlockSpec((None, tq, Dvp), lambda b, qi, ki: (b, qi, 0)),
            scratch_shapes=[
                pltpu.VMEM((tq, 1), jnp.float32),     # running max  m_i
                pltpu.VMEM((tq, 1), jnp.float32),     # running sum  l_i
                pltpu.VMEM((tq, Dvp), jnp.float32),   # output accumulator
            ],
        ),
        compiler_params=pltpu.CompilerParams(
            dimension_semantics=("parallel", "parallel", "arbitrary"),
            vmem_limit_bytes=32 * 1024 * 1024,
        ),
        cost_estimate=cost,
    )(qp, kp, vp)

    return out[:, :Lq, :Dv]


def additive_attention_ref(q, k, v, scale=1.0):
    """Plain-JAX reference mirroring the PyTorch forward."""
    w = jnp.sum(scale * jnp.tanh(q[..., :, None, :] + k[..., None, :, :]), axis=-1)
    w = jax.nn.softmax(w, axis=-1)
    return w @ v


if __name__ == "__main__":
    key = jax.random.PRNGKey(0)

    # --- small shape matching the module's intended use ---------------------
    B, Lq, Lk, D, Dv = 2, 8, 8, 32, 32
    kq, kk, kv = jax.random.split(key, 3)
    q = jax.random.normal(kq, (B, Lq, D), dtype=jnp.float32)
    k = jax.random.normal(kk, (B, Lk, D), dtype=jnp.float32)
    v = jax.random.normal(kv, (B, Lk, Dv), dtype=jnp.float32)

    out = additive_attention(q, k, v, scale=1.0)
    out = jax.block_until_ready(out)
    ref = additive_attention_ref(q, k, v, scale=1.0)
    assert out.shape == (B, Lq, Dv)
    assert jnp.allclose(out, ref, atol=1e-4, rtol=1e-4), \
        float(jnp.max(jnp.abs(out - ref)))

    # --- a second shape that exercises multi-tile online softmax, key masking
    #     and padding paths (still small) -------------------------------------
    B2, Lq2, Lk2, D2, Dv2 = 2, 100, 200, 96, 64
    kq2, kk2, kv2 = jax.random.split(jax.random.PRNGKey(1), 3)
    q2 = jax.random.normal(kq2, (B2, Lq2, D2), dtype=jnp.float32)
    k2 = jax.random.normal(kk2, (B2, Lk2, D2), dtype=jnp.float32)
    v2 = jax.random.normal(kv2, (B2, Lk2, Dv2), dtype=jnp.float32)

    out2 = additive_attention(q2, k2, v2, scale=0.5)
    out2 = jax.block_until_ready(out2)
    ref2 = additive_attention_ref(q2, k2, v2, scale=0.5)
    assert out2.shape == (B2, Lq2, Dv2)
    assert jnp.allclose(out2, ref2, atol=1e-4, rtol=1e-4), \
        float(jnp.max(jnp.abs(out2 - ref2)))

    print("KERNEL_OK")
</pallas_src>

<mosaic_0001>
module attributes {stable_mosaic.version = 11 : i64} {
  func.func @_additive_attn_kernel(%arg0: i32, %arg1: i32, %arg2: i32, %arg3: memref<1x8x128xf32, #tpu.memory_space<vmem>>, %arg4: memref<1x8x128xf32, #tpu.memory_space<vmem>>, %arg5: memref<1x8x128xf32, #tpu.memory_space<vmem>>, %arg6: memref<1x8x128xf32, #tpu.memory_space<vmem>>, %arg7: memref<8x1xf32, #tpu.memory_space<vmem>>, %arg8: memref<8x1xf32, #tpu.memory_space<vmem>>, %arg9: memref<8x128xf32, #tpu.memory_space<vmem>>) attributes {dimension_semantics = [#tpu.dimension_semantics<parallel>, #tpu.dimension_semantics<parallel>, #tpu.dimension_semantics<arbitrary>], iteration_bounds = array<i64: 2, 1, 1>, scalar_prefetch = 0 : i64, scratch_operands = 3 : i64, tpu.core_type = #tpu.core_type<tc>, window_params = [{transform_indices = @transform_0, window_bounds = array<i64: 1, 8, 128>}, {transform_indices = @transform_1, window_bounds = array<i64: 1, 8, 128>}, {transform_indices = @transform_2, window_bounds = array<i64: 1, 8, 128>}, {transform_indices = @transform_3, window_bounds = array<i64: 1, 8, 128>}]} {
    %c0_i32 = arith.constant 0 : i32
    %0 = arith.cmpi eq, %arg2, %c0_i32 : i32
    %1 = arith.extui %0 : i1 to i32
    %c0_i32_0 = arith.constant 0 : i32
    %2 = arith.cmpi ne, %1, %c0_i32_0 : i32
    scf.if %2 {
      %cst_26 = arith.constant -1.000000e+30 : f32
      %47 = vector.broadcast %cst_26 : f32 to vector<8x1xf32>
      %c0_27 = arith.constant 0 : index
      %c0_28 = arith.constant 0 : index
      %48 = vector.load %arg7[%c0_27, %c0_28] : memref<8x1xf32, #tpu.memory_space<vmem>>, vector<8x1xf32>
      tpu.vector_store %arg7[%c0_27, %c0_28], %47 {strides = array<i32>} : memref<8x1xf32, #tpu.memory_space<vmem>>, vector<8x1xf32>,
      %cst_29 = arith.constant 0.000000e+00 : f32
      %49 = vector.broadcast %cst_29 : f32 to vector<8x1xf32>
      %c0_30 = arith.constant 0 : index
      %c0_31 = arith.constant 0 : index
      %50 = vector.load %arg8[%c0_30, %c0_31] : memref<8x1xf32, #tpu.memory_space<vmem>>, vector<8x1xf32>
      tpu.vector_store %arg8[%c0_30, %c0_31], %49 {strides = array<i32>} : memref<8x1xf32, #tpu.memory_space<vmem>>, vector<8x1xf32>,
      %cst_32 = arith.constant 0.000000e+00 : f32
      %51 = vector.broadcast %cst_32 : f32 to vector<8x128xf32>
      %c0_33 = arith.constant 0 : index
      %c0_34 = arith.constant 0 : index
      %52 = vector.load %arg9[%c0_33, %c0_34] : memref<8x128xf32, #tpu.memory_space<vmem>>, vector<8x128xf32>
      tpu.vector_store %arg9[%c0_33, %c0_34], %51 {strides = array<i32>} : memref<8x128xf32, #tpu.memory_space<vmem>>, vector<8x128xf32>,
    } else {
    }
    %cst = arith.constant 0.000000e+00 : f32
    %3 = vector.broadcast %cst : f32 to vector<8x8xf32>
    %c0_i32_1 = arith.constant 0 : i32
    %c128_i32 = arith.constant 128 : i32
    %4 = arith.muli %c0_i32_1, %c128_i32 : i32
    %5 = tpu.assume_multiple %4, 128 : i32
    %c0 = arith.constant 0 : index
    %c0_2 = arith.constant 0 : index
    %6 = arith.index_cast %5 : i32 to index
    %7 = vector.load %arg3[%c0, %c0_2, %6] : memref<1x8x128xf32, #tpu.memory_space<vmem>>, vector<1x8x128xf32>
    %8 = vector.shape_cast %7 : vector<1x8x128xf32> to vector<8x128xf32>
    %c0_3 = arith.constant 0 : index
    %c0_4 = arith.constant 0 : index
    %9 = arith.index_cast %5 : i32 to index
    %10 = vector.load %arg4[%c0_3, %c0_4, %9] : memref<1x8x128xf32, #tpu.memory_space<vmem>>, vector<1x8x128xf32>
    %11 = vector.shape_cast %10 : vector<1x8x128xf32> to vector<8x128xf32>
    %12 = vector.shape_cast %8 : vector<8x128xf32> to vector<8x1x128xf32>
    %13 = vector.shape_cast %11 : vector<8x128xf32> to vector<1x8x128xf32>
    %14 = vector.broadcast %12 : vector<8x1x128xf32> to vector<8x8x128xf32>
    %15 = vector.broadcast %13 : vector<1x8x128xf32> to vector<8x8x128xf32>
    %16 = arith.addf %14, %15 : vector<8x8x128xf32>
    %17 = math.tanh %16 : vector<8x8x128xf32>
    %cst_5 = arith.constant dense<0.000000e+00> : vector<8x8xf32>
    %18 = vector.multi_reduction <add>, %17, %cst_5 [2] : vector<8x8x128xf32> to vector<8x8xf32>
    %19 = arith.addf %3, %18 : vector<8x8xf32>
    %c1_i32 = arith.constant 1 : i32
    %c0_6 = arith.constant 0 : index
    %c0_7 = arith.constant 0 : index
    %20 = vector.load %arg7[%c0_6, %c0_7] : memref<8x1xf32, #tpu.memory_space<vmem>>, vector<8x1xf32>
    %cst_8 = arith.constant dense<0xFF800000> : vector<8xf32>
    %21 = vector.multi_reduction <maximumf>, %19, %cst_8 [1] : vector<8x8xf32> to vector<8xf32>
    %22 = vector.shape_cast %21 : vector<8xf32> to vector<8x1xf32>
    %23 = arith.maximumf %20, %22 : vector<8x1xf32>
    %24 = arith.subf %20, %23 : vector<8x1xf32>
    %25 = math.exp %24 : vector<8x1xf32>
    %26 = vector.broadcast %23 : vector<8x1xf32> to vector<8x8xf32>
    %27 = arith.subf %19, %26 : vector<8x8xf32>
    %28 = math.exp %27 : vector<8x8xf32>
    %c0_9 = arith.constant 0 : index
    %c0_10 = arith.constant 0 : index
    %29 = vector.load %arg8[%c0_9, %c0_10] : memref<8x1xf32, #tpu.memory_space<vmem>>, vector<8x1xf32>
    %30 = arith.mulf %25, %29 : vector<8x1xf32>
    %cst_11 = arith.constant dense<0.000000e+00> : vector<8xf32>
    %31 = vector.multi_reduction <add>, %28, %cst_11 [1] : vector<8x8xf32> to vector<8xf32>
    %32 = vector.shape_cast %31 : vector<8xf32> to vector<8x1xf32>
    %33 = arith.addf %30, %32 : vector<8x1xf32>
    %c0_12 = arith.constant 0 : index
    %c0_13 = arith.constant 0 : index
    %34 = vector.load %arg8[%c0_12, %c0_13] : memref<8x1xf32, #tpu.memory_space<vmem>>, vector<8x1xf32>
    tpu.vector_store %arg8[%c0_12, %c0_13], %33 {strides = array<i32>} : memref<8x1xf32, #tpu.memory_space<vmem>>, vector<8x1xf32>,
    %c0_14 = arith.constant 0 : index
    %c0_15 = arith.constant 0 : index
    %35 = vector.load %arg9[%c0_14, %c0_15] : memref<8x128xf32, #tpu.memory_space<vmem>>, vector<8x128xf32>
    %36 = vector.broadcast %25 : vector<8x1xf32> to vector<8x128xf32>
    %37 = arith.mulf %36, %35 : vector<8x128xf32>
    %c0_16 = arith.constant 0 : index
    %c0_17 = arith.constant 0 : index
    %c0_18 = arith.constant 0 : index
    %38 = vector.load %arg5[%c0_16, %c0_17, %c0_18] : memref<1x8x128xf32, #tpu.memory_space<vmem>>, vector<1x8x128xf32>
    %39 = vector.shape_cast %38 : vector<1x8x128xf32> to vector<8x128xf32>
    %cst_19 = arith.constant dense<0.000000e+00> : vector<8x128xf32>
    %40 = tpu.matmul %28, %39, %cst_19 {dimension_numbers = #tpu.dot_dimension_numbers<[1], [0], [0], [1], [0, 0, 1, 1], [], []>} : vector<8x8xf32>, vector<8x128xf32>, vector<8x128xf32> -> vector<8x128xf32>
    %41 = arith.addf %37, %40 : vector<8x128xf32>
    %c0_20 = arith.constant 0 : index
    %c0_21 = arith.constant 0 : index
    %42 = vector.load %arg9[%c0_20, %c0_21] : memref<8x128xf32, #tpu.memory_space<vmem>>, vector<8x128xf32>
    tpu.vector_store %arg9[%c0_20, %c0_21], %41 {strides = array<i32>} : memref<8x128xf32, #tpu.memory_space<vmem>>, vector<8x128xf32>,
    %c0_22 = arith.constant 0 : index
    %c0_23 = arith.constant 0 : index
    %43 = vector.load %arg7[%c0_22, %c0_23] : memref<8x1xf32, #tpu.memory_space<vmem>>, vector<8x1xf32>
    tpu.vector_store %arg7[%c0_22, %c0_23], %23 {strides = array<i32>} : memref<8x1xf32, #tpu.memory_space<vmem>>, vector<8x1xf32>,
    %c0_i32_24 = arith.constant 0 : i32
    %44 = arith.cmpi eq, %arg2, %c0_i32_24 : i32
    %45 = arith.extui %44 : i1 to i32
    %c0_i32_25 = arith.constant 0 : i32
    %46 = arith.cmpi ne, %45, %c0_i32_25 : i32
    scf.if %46 {
      %c0_26 = arith.constant 0 : index
      %c0_27 = arith.constant 0 : index
      %47 = vector.load %arg8[%c0_26, %c0_27] : memref<8x1xf32, #tpu.memory_space<vmem>>, vector<8x1xf32>
      %48 = tpu.reciprocal %47 {approx = true} : vector<8x1xf32> -> vector<8x1xf32>
      %49 = arith.mulf %47, %48 : vector<8x1xf32>
      %cst_28 = arith.constant 2.000000e+00 : f32
      %50 = vector.broadcast %cst_28 : f32 to vector<8x1xf32>
      %51 = arith.subf %50, %49 : vector<8x1xf32>
      %52 = arith.mulf %48, %51 : vector<8x1xf32>
      %c0_29 = arith.constant 0 : index
      %c0_30 = arith.constant 0 : index
      %53 = vector.load %arg9[%c0_29, %c0_30] : memref<8x128xf32, #tpu.memory_space<vmem>>, vector<8x128xf32>
      %54 = vector.broadcast %52 : vector<8x1xf32> to vector<8x128xf32>
      %55 = arith.mulf %53, %54 : vector<8x128xf32>
      %c0_31 = arith.constant 0 : index
      %c0_32 = arith.constant 0 : index
      %c0_33 = arith.constant 0 : index
      %56 = vector.load %arg6[%c0_31, %c0_32, %c0_33] : memref<1x8x128xf32, #tpu.memory_space<vmem>>, vector<1x8x128xf32>
      %57 = vector.shape_cast %56 : vector<1x8x128xf32> to vector<8x128xf32>
      %58 = vector.shape_cast %55 : vector<8x128xf32> to vector<1x8x128xf32>
      tpu.vector_store %arg6[%c0_31, %c0_32, %c0_33], %58 {strides = array<i32>} : memref<1x8x128xf32, #tpu.memory_space<vmem>>, vector<1x8x128xf32>,
    } else {
    }
    return
  }
  func.func @transform_0(%arg0: i32, %arg1: i32, %arg2: i32) -> (i32, i32, i32) {
    %c0_i32 = arith.constant 0 : i32
    %c0_i32_0 = arith.constant 0 : i32
    return %arg0, %arg1, %c0_i32 : i32, i32, i32
  }
  func.func @transform_1(%arg0: i32, %arg1: i32, %arg2: i32) -> (i32, i32, i32) {
    %c0_i32 = arith.constant 0 : i32
    %c0_i32_0 = arith.constant 0 : i32
    return %arg0, %arg2, %c0_i32 : i32, i32, i32
  }
  func.func @transform_2(%arg0: i32, %arg1: i32, %arg2: i32) -> (i32, i32, i32) {
    %c0_i32 = arith.constant 0 : i32
    %c0_i32_0 = arith.constant 0 : i32
    return %arg0, %arg2, %c0_i32 : i32, i32, i32
  }
  func.func @transform_3(%arg0: i32, %arg1: i32, %arg2: i32) -> (i32, i32, i32) {
    %c0_i32 = arith.constant 0 : i32
    %c0_i32_0 = arith.constant 0 : i32
    return %arg0, %arg1, %c0_i32 : i32, i32, i32
  }
}

</mosaic_0001>

<bundles_post_ra>
// kernel: tpu_custom_call.1
= control target key start
LH: loop header
LB: loop body
LE: loop exit
PB: predicated region body
PF: predicated region fallthrough
CT: control target
= control target key end

     0   :  { %s1580_s0 = inlined_call_operand.hbm [shape: f32[2,8,128], index: 0, kind: input, shape index: {}]   ;;  %s1581_s1 = inlined_call_operand.hbm [shape: f32[2,8,128], index: 1, kind: input, shape index: {}]   ;;  %s1582_s2 = inlined_call_operand.hbm [shape: f32[2,8,128], index: 2, kind: input, shape index: {}]   ;;  %s1583_s3 = inlined_call_operand.hbm [shape: f32[2,8,128], index: 3, kind: output, shape index: {}]  }
   0x1   :  { %1589 = sst [smem:[#allocation18_spill]] %s1581_s1 }
   0x2   :  { %8 = vsyncpa [#allocation6], 0 }
   0x3   :  { %10 = vsyncpa [#allocation6 + $0x1], 0 }
   0x4   :  { %11 = vsyncpa [#allocation9], 0 }
   0x5   :  { %13 = vsyncpa [#allocation9 + $0x1], 0 }
   0x6   :  { %14 = vsyncpa [#allocation7], 0 }
   0x7   :  { %16 = vsyncpa [#allocation7 + $0x1], 0  ;;  %s1233_s12 = smov 0   ;;  %s1235_s13 = smov 0  }
   0x8   :  { %s1237_s14 = smov 0   ;;  %s1239_s15 = smov 0  }
   0x9   :  { %s1241_s16 = smov 0   ;;  %s1243_s17 = smov 0  }
   0xa LB: > { %1590 = sst [smem:[#allocation15_spill]] %s1198_s16  ;;  %s1264_s18 = sadd.s32 4294967295, %s1202_s17   ;;  %s1202_s17 = sphi %s1243_s17, %s22_s17   ;;  %s1198_s16 = sphi %s1241_s16, %s1611_s16   ;;  %s1194_s15 = sphi %s1239_s15, %s1610_s15   ;;  %s1190_s14 = sphi %s1237_s14, %s1614_s14   ;;  %s1186_s13 = sphi %s1235_s13, %s1613_s13   ;;  %s1182_s12 = sphi %s1233_s12, %s1612_s12  }
   0xb   : > { %s884_s19 = sadd.s32 4294967294, %s1202_s17   ;;  %s41_s20 = sadd.s32 1, %s1198_s16 }
   0xc   : > { %s50_s21 = sadd.s32 1, %s1190_s14  ;;  %p43_p0 = scmp.ge.s32.totalorder %s41_s20, 2 }
   0xd   : > { %p57_p1 = scmp.ne.s32.totalorder %s1190_s14, %s1186_s13  ;;  %p58_p2 = scmp.eq.s32.totalorder %s1202_s17, 0 }
   0xe   : > { %p63_p3 = scmp.ne.s32.totalorder %s1186_s13, %s1182_s12  ;;  %s1616_s20 = smov (%p43_p0, %s41_s20), 0 }
   0xf   : > { %1591 = sst [smem:[#allocation16_spill]] %s1616_s20  ;;  %p1276_p4 = por %p58_p2, %p57_p1 }
  0x10   : > { %p64_p5 = scmp.eq.s32.totalorder %s1264_s18, 0  ;;  %s45_s23 = ssub.s32 %s1198_s16, %s1616_s20 }
  0x11   : > { %p145_p6 = scmp.eq.s32.totalorder %s1264_s18, 1  ;;  %p48_p7 = scmp.eq.s32.totalorder %s45_s23, 0 }
  0x12   : > { %p1284_p8 = por %p64_p5, %p63_p3  ;;  %p151_p10 = scmp.eq.s32.totalorder %s884_s19, 1 }
  0x13   : > { %p1288_p9 = por %p145_p6, %p57_p1  ;;  %p932_p13 = scmp.lt.s32.totalorder %s1202_s17, 2 }
  0x14   : > { %s1593_s24 = scalar_select %p1284_p8, 1, 0 }
  0x15   : > { %s1594_s25 = scalar_select %p1288_p9, 1, 0 }
  0x16   : > { %s1293_s26 = scalar_select %p48_p7, %s1190_s14, %s50_s21  }
  0x17   : > { %p1295_p11 = por %p151_p10, %p63_p3  ;;  %s171_s28 = sand.u32 1, %s1190_s14  }
  0x18   : > { %1595 = sst [smem:[#allocation17_spill]] %s1293_s26  ;;  %s1304_s29 = sshll.u32 %s171_s28, 3 }
  0x19   : > { %s1596_s27 = scalar_select %p1295_p11, 1, 0 }
  0x1a   : > { %s1307_s30 = sshll.u32 %s1198_s16, 7  ;;  %p1311_p0 = pnand %p932_p13, %p1276_p4 }
  0x1b   : > { %s190_s5 = sand.u32 1, %s1202_s17   ;;  %s1598_s1 = sld [smem:[#allocation18_spill]] }
  0x1c   : > { %s1597_s4 = scalar_select %p1311_p0, 1, 0 }
  0x1d   : > { %s194_s9 = scalar_lea.vmem [#allocation8], %s1304_s29  ;;  %s1327_s11 = scalar_lea.sflag [#allocation9], %s190_s5 }
  0x1e   : > { %s202_s10 = sshll.u32 %s194_s9, 4  ;;  %p1333_p4 = pneg %p1311_p0  ;;  %s1324_s10 = int_to_ptr.vmem [resolvable:$true] %s202_s10 }
  0x21   : > { %s1320_s8 = scalar_lea.hbm %s1598_s1, %s1307_s30  ;;  %s1031_s6 = scalar_lea.hbm %s1598_s1, 256 }
  0x22   : > { %s1026_s19 = scalar_lea.hbm %s1320_s8, 128  ;;  %p1032_p7 = scmp.lt.u32.totalorder %s1320_s8, %s1598_s1 }
  0x23   : > { %p1027_p3 = scmp.ne.s32.totalorder %s1320_s8, %s1026_s19  ;;  %p1033_p10 = scmp.lt.u32.totalorder %s1031_s6, %s1026_s19 }
  0x24   : > { %p1035_p12 = scmp.lt.u32.totalorder %s1026_s19, %s1320_s8 }
  0x25   : > { %p1029_p5 = pnand %p1333_p4, %p1027_p3  ;;  %p1034_p13 = por %p1033_p10, %p1032_p7 }
  0x27   : > { %p1030_p6 = pneg %p1029_p5  ;;  %p1036_p1 = por %p1035_p12, %p1034_p13 }
  0x29   : > { %p1037_p2 = pnand %p1036_p1, %p1030_p6 }
  0x2b   : > { %1040 = shalt.err (!%p1037_p2)
}
  0x2c   : > { %s1041_s5 = scalar_lea.vmem %s1324_s10, 128  ;;  %s1204_s22 = smov [#allocation8]  }
  0x2d   : > { %p1042_p3 = scmp.ne.s32.totalorder %s1324_s10, %s1041_s5  ;;  %s1046_s23 = sshll.u32 %s1204_s22, 4  ;;  %s1047_s23 = int_to_ptr.vmem [resolvable:$false] %s1046_s23 }
  0x2e   : > { %s1048_s7 = scalar_lea.vmem %s1047_s23, 256  ;;  %p1049_p9 = scmp.lt.s32.totalorder %s1324_s10, %s1047_s23 }
  0x2f   : > { %p1044_p5 = pnand %p1042_p3, %p1333_p4  ;;  %p1050_p8 = scmp.lt.s32.totalorder %s1048_s7, %s1041_s5 }
  0x31   : > { %p1045_p11 = pneg %p1044_p5  ;;  %p1051_p7 = por %p1050_p8, %p1049_p9 }
  0x33   : > { %p1052_p10 = pnand %p1051_p7, %p1045_p11 }
  0x35   : > { %1055 = shalt.err (!%p1052_p10)
}
  0x36   : > { %924 = dma.hbm_to_vmem [thread:$0]  (!%p1311_p0), %s1320_s8, 128, %s1324_s10, %s1327_s11  }
  0x37   : > { %p1600_p12 = scmp.lt.s32.totalorder %s1202_s17, 3  ;;  %p1601_p1 = scmp.ge.s32.totalorder %s1202_s17, 1 }
  0x38   : > { %s1369_s5 = scalar_lea.hbm %s1580_s0, %s1307_s30  ;;  %s175_s22 = scalar_lea.vmem [#allocation5], %s1304_s29 }
  0x39   : > { %p1361_p2 = pnand %p1601_p1, %p1600_p12  ;;  %s183_s23 = sshll.u32 %s175_s22, 4  ;;  %s1372_s23 = int_to_ptr.vmem [resolvable:$true] %s183_s23 }
  0x3a   : > { %s1378_s7 = scalar_lea.hbm %s1582_s2, %s1307_s30  ;;  %s172_s1 = scalar_lea.sflag [#allocation6], %s171_s28 }
  0x3b   : > { %s1602_s19 = scalar_select %p1361_p2, 1, 0 }
  0x3c   : > { %s1056_s20 = scalar_lea.hbm %s1369_s5, 128  ;;  %s1061_s16 = scalar_lea.hbm %s1580_s0, 256 }
  0x3d   : > { %p1057_p8 = scmp.ne.s32.totalorder %s1369_s5, %s1056_s20  ;;  %p1062_p6 = scmp.lt.u32.totalorder %s1369_s5, %s1580_s0 }
  0x3e   : > { %p1063_p13 = scmp.lt.u32.totalorder %s1061_s16, %s1056_s20  ;;  %p1065_p5 = scmp.lt.u32.totalorder %s1056_s20, %s1369_s5 }
  0x3f   : > { %p1059_p9 = pnand %p1057_p8, %p1333_p4 }
  0x40   : > { %p1064_p3 = por %p1063_p13, %p1062_p6 }
  0x41   : > { %p1060_p11 = pneg %p1059_p9 }
  0x42   : > { %p1066_p7 = por %p1065_p5, %p1064_p3 }
  0x44   : > { %p1067_p10 = pnand %p1066_p7, %p1060_p11 }
  0x46   : > { %1070 = shalt.err (!%p1067_p10)
}
  0x47   : > { %s1071_s28 = scalar_lea.vmem %s1372_s23, 128  ;;  %s1205_s30 = smov [#allocation5]  }
  0x48   : > { %p1072_p12 = scmp.ne.s32.totalorder %s1372_s23, %s1071_s28  ;;  %s1076_s8 = sshll.u32 %s1205_s30, 4  ;;  %s1077_s8 = int_to_ptr.vmem [resolvable:$false] %s1076_s8 }
  0x49   : > { %s1078_s26 = scalar_lea.vmem %s1077_s8, 256  ;;  %p1079_p9 = scmp.lt.s32.totalorder %s1372_s23, %s1077_s8 }
  0x4a   : > { %p1074_p1 = pnand %p1072_p12, %p1333_p4  ;;  %p1080_p2 = scmp.lt.s32.totalorder %s1078_s26, %s1071_s28 }
  0x4c   : > { %p1075_p8 = pneg %p1074_p1  ;;  %p1081_p6 = por %p1080_p2, %p1079_p9 }
  0x4e   : > { %p1082_p13 = pnand %p1081_p6, %p1075_p8 }
  0x50   : > { %1085 = shalt.err (!%p1082_p13)
}
  0x51   : > { %921 = dma.hbm_to_vmem [thread:$0]  (!%p1311_p0), %s1369_s5, 128, %s1372_s23, %s172_s1  }
  0x52   : > { %s213_s16 = scalar_lea.vmem [#allocation10], %s1304_s29  ;;  %s1086_s10 = scalar_lea.hbm %s1378_s7, 128 }
  0x53   : > { %s221_s20 = sshll.u32 %s213_s16, 4  ;;  %p1087_p11 = scmp.ne.s32.totalorder %s1378_s7, %s1086_s10  ;;  %s222_s20 = int_to_ptr.vmem [resolvable:$true] %s221_s20 }
  0x54   : > { %s1091_s22 = scalar_lea.hbm %s1582_s2, 256  ;;  %p1092_p5 = scmp.lt.u32.totalorder %s1378_s7, %s1582_s2 }
  0x55   : > { %p1089_p2 = pnand %p1087_p11, %p1333_p4  ;;  %p1093_p7 = scmp.lt.u32.totalorder %s1091_s22, %s1086_s10 }
  0x56   : > { %p1095_p12 = scmp.lt.u32.totalorder %s1086_s10, %s1378_s7 }
  0x57   : > { %p1090_p3 = pneg %p1089_p2  ;;  %p1094_p10 = por %p1093_p7, %p1092_p5 }
  0x59   : > { %p1096_p1 = por %p1095_p12, %p1094_p10 }
  0x5b   : > { %p1097_p8 = pnand %p1096_p1, %p1090_p3 }
  0x5d   : > { %1100 = shalt.err (!%p1097_p8)
}
  0x5e   : > { %s1101_s1 = scalar_lea.vmem %s222_s20, 128  ;;  %s1206_s29 = smov [#allocation10]  }
  0x5f   : > { %p1102_p9 = scmp.ne.s32.totalorder %s222_s20, %s1101_s1  ;;  %s1106_s5 = sshll.u32 %s1206_s29, 4  ;;  %s1107_s5 = int_to_ptr.vmem [resolvable:$false] %s1106_s5 }
  0x60   : > { %s1108_s23 = scalar_lea.vmem %s1107_s5, 256  ;;  %p1109_p11 = scmp.lt.s32.totalorder %s222_s20, %s1107_s5 }
  0x61   : > { %p1104_p6 = pnand %p1102_p9, %p1333_p4  ;;  %p1110_p2 = scmp.lt.s32.totalorder %s1108_s23, %s1101_s1 }
  0x63   : > { %p1105_p13 = pneg %p1104_p6  ;;  %p1111_p0 = por %p1110_p2, %p1109_p11 }
  0x65   : > { %p1112_p5 = pnand %p1111_p0, %p1105_p13 }
  0x67   : > { %1115 = shalt.err (!%p1112_p5)
}
  0x68   : > { %p1603_p7 = scmp.ne.s32.totalorder %s1597_s4, 0  ;;  %p1604_p3 = scmp.ne.s32.totalorder %s1602_s19, 0 }
  0x69   : > { %s1425_s21 = sand.u32 (!%p1604_p3), 1, %s1186_s13   ;;  %p1605_p0 = scmp.ne.s32.totalorder (!%p1604_p3), %s1593_s24, 0 }
  0x6a   : > { %927 = dma.hbm_to_vmem [thread:$0]  (!%p1603_p7), %s1378_s7, 128, %s222_s20, %s1327_s11  }
  0x6b   : > { %230 = sbr.rel (%p1604_p3) target bundleno = 1064 (0x428), region = 32  ;;  %s1428_s8 = sshll.u32 (!%p1604_p3), %s1425_s21, 3 }
  0x6c   : > { %s233_s26 = scalar_lea.sflag (!%p1604_p3), [#allocation6], %s1425_s21  ;;  %s236_s16 = scalar_lea.vmem (!%p1604_p3), [#allocation5], %s1428_s8 }
  0x72   : > { %1169 = dma.done.wait (%p1605_p0), %s233_s26, 128  }
  0x73   : > { %1171 = vsyncadd (%p1605_p0), %s233_s26, 4294967168  ;;  %s241_s4 = sand.u32 1, %s1264_s18   ;;  %s245_s19 = scalar_lea.vmem [#allocation8], %s1428_s8 }
  0x74   : > { %s242_s11 = scalar_lea.sflag [#allocation9], %s241_s4 }
  0x75   : > { %1173 = dma.done.wait (%p1605_p0), %s242_s11, 256  }
  0x76   : > { %1175 = vsyncadd (%p1605_p0), %s242_s11, 4294967040  ;;  %v302_v0 = vlaneseq  ;;  %v1207_v1 = vmov 1966171168   ;;  %v295_v6 = vld [vmem:[%s236_s16] sm:$0xff]  ;;  %v296_v13 = vld [vmem:[%s245_s19] sm:$0xff]  ;;  %vm291_vm0 = vcmask 7168  }
  0x77   : > { %v300_v2 = vunpack.c.l.s4 %v1207_v1  ;;  %v298_v9 = vcombine.high %v295_v6, %v295_v6  ;;  %v1208_v46 = vmov -1e+30   ;;  %vm470_vm1 = vcmask 1041409   ;;  %s254_s18 = scalar_lea.vmem [#allocation10], %s1428_s8  ;;  %s900_s24 = sshll.u32 %s1194_s15, 7 }
  0x78   : > { %v1443_v3 = vshrl.u32 %v302_v0, 7  ;;  %292 = vst.msk [vmem:[#allocation2] sm:$0xff] %vm291_vm0, %v1208_v46  ;;  %v437_v47 = vand.u32 127, %v302_v0  ;;  %vm472_vm2 = vcmask 1042434   ;;  %vm474_vm3 = vcmask 1043459   ;;  %s286_s7 = scalar_lea.vmem [#allocation11], %s1428_s8  ;;  %s1531_s9 = scalar_lea.hbm %s1583_s3, %s900_s24 }
  0x79   : > { %v301_v4 = vunpack.c.0.s8 %v300_v2  ;;  %vm476_vm4 = vcmask 1044484   ;;  %vm478_vm5 = vcmask 1045509   ;;  %vm480_vm6 = vcmask 1046534   ;;  %s755_s20 = sshll.u32 %s286_s7, 4  ;;  %s741_s22 = scalar_lea.sflag [#allocation7], %s1425_s21  ;;  %s1533_s20 = int_to_ptr.vmem [resolvable:$true] %s755_s20 }
  0x7a   : > { %v1447_v8 = vsub.s32 0, %v1443_v3  ;;  %v1460_v49 = vsub.s32 %v437_v47, %v1443_v3  ;;  %vm482_vm7 = vcmask 1047559   ;;  %vm485_vm8 = vcmask 64512   ;;  %s1116_s28 = scalar_lea.vmem %s1533_s20, 128  ;;  %p1606_p10 = scmp.ne.s32.totalorder %s1594_s25, 0 }
  0x7b   : > { %v304_v5 = vsub.s32 %v301_v4, %v1443_v3  ;;  %vm1211_vm9 = vmmov 0   ;;  %p1117_p4 = scmp.ne.s32.totalorder %s1533_s20, %s1116_s28  ;;  %s1212_s15 = smov [#allocation11]  }
  0x7c   : > { %s1120_s30 = sshll.u32 %s1212_s15, 4  ;;  %s1121_s30 = int_to_ptr.vmem [resolvable:$false] %s1120_s30 }
  0x7d   : > { %v305_v7 = vrot.slane %v295_v6, %v304_v5  ;;  %v312_v11 = vrot.slane %v298_v9, %v304_v5  ;;  %p1118_p12 = pnand %p1117_p4, %p1606_p10  ;;  %s1122_s1 = scalar_lea.vmem %s1121_s30, 256 }
  0x7e   : > { %p1123_p8 = scmp.lt.s32.totalorder %s1533_s20, %s1121_s30  ;;  %p1124_p9 = scmp.lt.s32.totalorder %s1122_s1, %s1116_s28 }
  0x7f   : > { %v321_v10 = vrot.slane %v305_v7, %v304_v5  ;;  %v313_v12 = vcombine.high %v305_v7, %v305_v7  ;;  %v314_v15 = vcombine.high %v312_v11, %v312_v11  ;;  %v328_v16 = vrot.slane %v312_v11, %v304_v5  ;;  %p1119_p1 = pneg %p1118_p12 }
  0x80   : > { %v1209_v11 = vmov 0   ;;  %p1125_p6 = por %p1124_p9, %p1123_p8 }
  0x81   : > { %v350_v14 = vrot.slane %v321_v10, %v1447_v8  ;;  %v335_v17 = vrot.slane %v313_v12, %v304_v5  ;;  %v343_v18 = vcombine.high %v321_v10, %v321_v10  ;;  %v366_v22 = vrot.slane %v328_v16, %v1447_v8  ;;  %987 = vset.pattern.permute.xlu1 %v1209_v11 }
  0x82   : > { %v342_v24 = vrot.slane %v314_v15, %v304_v5  ;;  %v344_v25 = vcombine.high %v328_v16, %v328_v16  ;;  %988 = vset.pattern.permute.xlu0 %v1209_v11  ;;  %v1210_v12 = vmov 0.0   ;;  %p1126_p13 = pnand %p1125_p6, %p1119_p1 }
  0x83   : > { %v387_v19 = vadd.f32 %v350_v14, %v296_v13  ;;  %v345_v20 = vcombine.high %v335_v17, %v335_v17  ;;  %v354_v21 = vrot.slane %v335_v17, %v1447_v8  ;;  %v358_v23 = vrot.slane %v343_v18, %v1447_v8  ;;  %293 = vst.msk [vmem:[#allocation3] sm:$0xff] %vm291_vm0, %v1210_v12 }
  0x84   : > { %v370_v29 = vrot.slane %v342_v24, %v1447_v8  ;;  %v346_v30 = vcombine.high %v342_v24, %v342_v24  ;;  %v391_v32 = vadd.f32 %v366_v22, %v296_v13  ;;  %v374_v33 = vrot.slane %v344_v25, %v1447_v8  ;;  %905 = vmatprep.subr.mxu0 %v1210_v12 }
  0x85   : > { %990 = vtanh.f32 %v387_v19  ;;  %v388_v26 = vadd.f32 %v354_v21, %v296_v13  ;;  %v362_v27 = vrot.slane %v345_v20, %v1447_v8  ;;  %v389_v28 = vadd.f32 %v358_v23, %v296_v13  ;;  %907 = vmatprep.mubr.msk.f32.mxu0 %vm1211_vm9, %v1210_v12 }
  0x86   : > { %v392_v34 = vadd.f32 %v370_v29, %v296_v13  ;;  %v378_v35 = vrot.slane %v346_v30, %v1447_v8  ;;  %v393_v36 = vadd.f32 %v374_v33, %v296_v13  ;;  %v503_v17 = vsub.s32 1, %v1443_v3 }
  0x87   : > { %992 = vtanh.f32 %v388_v26  ;;  %v390_v31 = vadd.f32 %v362_v27, %v296_v13  ;;  %v507_v18 = vsub.s32 2, %v1443_v3  ;;  %v511_v19 = vsub.s32 3, %v1443_v3 }
  0x88   : > { %994 = vtanh.f32 %v389_v28  ;;  %v394_v37 = vadd.f32 %v378_v35, %v296_v13  ;;  %v427_v13 = vld [vmem:[#allocation2] sm:$0xff]  ;;  %v515_v26 = vsub.s32 4, %v1443_v3 }
  0x89   : > { %996 = vtanh.f32 %v390_v31 }
  0x8a   : > { %998 = vtanh.f32 %v391_v32  ;;  %v519_v32 = vsub.s32 5, %v1443_v3 }
  0x8b   : > { %1000 = vtanh.f32 %v392_v34 }
  0x8c   : > { %1002 = vtanh.f32 %v393_v36 }
  0x8d   : > { %1004 = vtanh.f32 %v394_v37 }
  0x8f   : > { %v991_v38 = vpop.eup %990 }
  0x90   : > { %403 = vadd.xlane.f32.xlu0 %v991_v38 }
  0x91   : > { %v993_v39 = vpop.eup %992 }
  0x92   : > { %v995_v40 = vpop.eup %994 }
  0x93   : > { %407 = vadd.xlane.f32.xlu1 %v995_v40  ;;  %v997_v41 = vpop.eup %996 }
  0x94   : > { %405 = vadd.xlane.f32.xlu0 %v993_v39  ;;  %v999_v42 = vpop.eup %998  ;;  %v527_v39 = vsub.s32 7, %v1443_v3 }
  0x95   : > { %v1001_v43 = vpop.eup %1000 }
  0x96   : > { %v1003_v44 = vpop.eup %1002 }
  0x97   : > { %409 = vadd.xlane.f32.xlu1 %v997_v41  ;;  %v1005_v45 = vpop.eup %1004 }
  0x98   : > { %411 = vadd.xlane.f32.xlu0 %v999_v42 }
  0x9b   : > { %413 = vadd.xlane.f32.xlu1 %v1001_v43 }
  0x9c   : > { %415 = vadd.xlane.f32.xlu0 %v1003_v44 }
  0x9f   : > { %417 = vadd.xlane.f32.xlu1 %v1005_v45 }
 0x11d   : > { %v404_v48 = vpop.xlane.xlu0 %403 }
 0x11e   : > { %v441_v52 = vrot.slane %v404_v48, %v1460_v49 }
 0x120   : > { %v1462_v50 = vpop.xlane.xlu1 %407 }
 0x121   : > { %v406_v51 = vpop.xlane.xlu0 %405  ;;  %v449_v54 = vrot.slane %v1462_v50, %v1460_v49 }
 0x122   : > { %v445_v53 = vrot.slane %v406_v51, %v1460_v49 }
 0x124   : > { %v471_v55 = vsel %vm470_vm1, %v445_v53, %v441_v52  ;;  %v410_v56 = vpop.xlane.xlu1 %409 }
 0x125   : > { %v473_v57 = vsel %vm472_vm2, %v449_v54, %v471_v55  ;;  %v453_v58 = vrot.slane %v410_v56, %v1460_v49  ;;  %v412_v59 = vpop.xlane.xlu0 %411 }
 0x126   : > { %v457_v60 = vrot.slane %v412_v59, %v1460_v49 }
 0x127   : > { %v475_v61 = vsel %vm474_vm3, %v453_v58, %v473_v57  ;;  %v648_v58 = vld [vmem:[%s254_s18] sm:$0xff] }
 0x128   : > { %v477_v62 = vsel %vm476_vm4, %v457_v60, %v475_v61  ;;  %v1474_v63 = vpop.xlane.xlu1 %413  ;;  %906 = vmatpush3.msra.mxu0 %v648_v58 }
 0x129   : > { %v461_v0 = vrot.slane %v1474_v63, %v1460_v49  ;;  %v1478_v1 = vpop.xlane.xlu0 %415 }
 0x12a   : > { %v465_v2 = vrot.slane %v1478_v1, %v1460_v49 }
 0x12b   : > { %v479_v4 = vsel %vm478_vm5, %v461_v0, %v477_v62 }
 0x12c   : > { %v1483_v5 = vpop.xlane.xlu1 %417  ;;  %v481_v6 = vsel %vm480_vm6, %v465_v2, %v479_v4 }
 0x12d   : > { %v469_v7 = vrot.slane %v1483_v5, %v1460_v49 }
 0x12f   : > { %v483_v9 = vsel %vm482_vm7, %v469_v7, %v481_v6 }
 0x130   : > { %v486_v10 = vsel %vm485_vm8, %v483_v9, -inf }
 0x131   : > { %487 = vmax.xlane.f32.xlu0 %v486_v10 }
 0x1be   : > { %v488_v14 = vpop.xlane.xlu0 %487 }
 0x1bf   : > { %v489_v15 = vmax.f32 %v427_v13, %v488_v14 }
 0x1c1   : > { %v490_v16 = vsub.f32 %v427_v13, %v489_v15  ;;  %723 = vst.msk [vmem:[#allocation2] sm:$0xff] %vm291_vm0, %v489_v15  ;;  %495 = vperm.xlu1 %987, %v489_v15  }
 0x1c3   : > { %v491_v31 = vmul.f32 1.442695, %v490_v16 }
 0x240   : > { %v496_v20 = vpop.permute.xlu1 %495 }
 0x241   : > { %v500_v21 = vrot.slane %v496_v20, %v1447_v8  ;;  %v504_v22 = vrot.slane %v496_v20, %v503_v17  ;;  %v508_v23 = vrot.slane %v496_v20, %v507_v18  ;;  %v512_v27 = vrot.slane %v496_v20, %v511_v19 }
 0x242   : > { %v516_v33 = vrot.slane %v496_v20, %v515_v26  ;;  %v523_v8 = vsub.s32 6, %v1443_v3  ;;  %v520_v36 = vrot.slane %v496_v20, %v519_v32  ;;  %v528_v45 = vrot.slane %v496_v20, %v527_v39 }
 0x243   : > { %v537_v24 = vsub.f32 %v404_v48, %v500_v21  ;;  %v538_v25 = vsub.f32 %v406_v51, %v504_v22  ;;  %v539_v28 = vsub.f32 %v1462_v50, %v508_v23  ;;  %v540_v34 = vsub.f32 %v410_v56, %v512_v27  ;;  %v561_v21 = vld [vmem:[#allocation3] sm:$0xff] }
 0x244   : > { %v541_v37 = vsub.f32 %v412_v59, %v516_v33  ;;  %v524_v40 = vrot.slane %v496_v20, %v523_v8  ;;  %v542_v41 = vsub.f32 %v1474_v63, %v520_v36  ;;  %v544_v3 = vsub.f32 %v1483_v5, %v528_v45 }
 0x245   : > { %v545_v29 = vmul.f32 1.442695, %v537_v24  ;;  %v547_v30 = vmul.f32 1.442695, %v538_v25  ;;  %v549_v35 = vmul.f32 1.442695, %v539_v28 }
 0x246   : > { %v551_v38 = vmul.f32 1.442695, %v540_v34  ;;  %v553_v42 = vmul.f32 1.442695, %v541_v37  ;;  %v543_v46 = vsub.f32 %v1478_v1, %v524_v40  ;;  %v555_v47 = vmul.f32 1.442695, %v542_v41 }
 0x247   : > { %1006 = vpow2.f32 %v545_v29  ;;  %v559_v53 = vmul.f32 1.442695, %v544_v3 }
 0x248   : > { %1008 = vpow2.f32 %v547_v30  ;;  %v557_v51 = vmul.f32 1.442695, %v543_v46 }
 0x249   : > { %1010 = vpow2.f32 %v491_v31 }
 0x24a   : > { %1012 = vpow2.f32 %v549_v35 }
 0x24b   : > { %1014 = vpow2.f32 %v551_v38 }
 0x24c   : > { %1016 = vpow2.f32 %v553_v42 }
 0x24d   : > { %1018 = vpow2.f32 %v555_v47 }
 0x24e   : > { %1020 = vpow2.f32 %v557_v51 }
 0x24f   : > { %1022 = vpow2.f32 %v559_v53 }
 0x251   : > { %v1007_v43 = vpop.eup %1006 }
 0x252   : > { %v1009_v44 = vpop.eup %1008  ;;  %572 = vperm.xlu0 %988, %v1007_v43  }
 0x253   : > { %575 = vperm.xlu1 %987, %v1009_v44   ;;  %v1011_v48 = vpop.eup %1010 }
 0x254   : > { %v1013_v50 = vpop.eup %1012  ;;  %v562_v22 = vmul.f32 %v1011_v48, %v561_v21 }
 0x255   : > { %v1015_v52 = vpop.eup %1014 }
 0x256   : > { %644 = vperm.xlu0 %988, %v1011_v48   ;;  %v1017_v54 = vpop.eup %1016 }
 0x257   : > { %578 = vperm.xlu1 %987, %v1013_v50   ;;  %v1019_v55 = vpop.eup %1018 }
 0x258   : > { %v1021_v56 = vpop.eup %1020 }
 0x259   : > { %v1023_v57 = vpop.eup %1022 }
 0x25b   : > { %581 = vperm.xlu1 %987, %v1015_v52  }
 0x25f   : > { %584 = vperm.xlu1 %987, %v1017_v54  }
 0x263   : > { %587 = vperm.xlu1 %987, %v1019_v55  }
 0x267   : > { %590 = vperm.xlu1 %987, %v1021_v56  }
 0x26b   : > { %593 = vperm.xlu1 %987, %v1023_v57  }
 0x2d1   : > { %v573_v63 = vpop.permute.xlu0 %572 }
 0x2d2   : > { %v576_v59 = vpop.permute.xlu1 %575  ;;  %v598_v2 = vrot.slane %v573_v63, %v1460_v49 }
 0x2d3   : > { %v602_v1 = vrot.slane %v576_v59, %v1460_v49 }
 0x2d5   : > { %v627_v9 = vsel %vm470_vm1, %v602_v1, %v598_v2  ;;  %v645_v31 = vpop.permute.xlu0 %644 }
 0x2d6   : > { %v579_v60 = vpop.permute.xlu1 %578  ;;  %v647_v32 = vmul.f32 0.0, %v645_v31 }
 0x2d7   : > { %v606_v4 = vrot.slane %v579_v60, %v1460_v49 }
 0x2d9   : > { %v628_v11 = vsel %vm472_vm2, %v606_v4, %v627_v9 }
 0x2da   : > { %v582_v61 = vpop.permute.xlu1 %581 }
 0x2db   : > { %v610_v5 = vrot.slane %v582_v61, %v1460_v49 }
 0x2dd   : > { %v629_v13 = vsel %vm474_vm3, %v610_v5, %v628_v11 }
 0x2de   : > { %v585_v62 = vpop.permute.xlu1 %584 }
 0x2df   : > { %v614_v6 = vrot.slane %v585_v62, %v1460_v49 }
 0x2e1   : > { %v630_v14 = vsel %vm476_vm4, %v614_v6, %v629_v13 }
 0x2e2   : > { %v588_v0 = vpop.permute.xlu1 %587 }
 0x2e3   : > { %v618_v10 = vrot.slane %v588_v0, %v1460_v49 }
 0x2e5   : > { %v631_v16 = vsel %vm478_vm5, %v618_v10, %v630_v14 }
 0x2e6   : > { %v591_v7 = vpop.permute.xlu1 %590 }
 0x2e7   : > { %v622_v12 = vrot.slane %v591_v7, %v1460_v49 }
 0x2e9   : > { %v632_v18 = vsel %vm480_vm6, %v622_v12, %v631_v16 }
 0x2ea   : > { %v594_v15 = vpop.permute.xlu1 %593 }
 0x2eb   : > { %v626_v17 = vrot.slane %v594_v15, %v1460_v49 }
 0x2ed   : > { %v633_v19 = vsel %vm482_vm7, %v626_v17, %v632_v18 }
 0x2ee   : > { %908 = vmatmul.mubr.msk.f32.vlgmr.msra.gmra.mrb[0].mxu0 %vm485_vm8, %v633_v19  ;;  %v635_v20 = vsel %vm485_vm8, %v633_v19, 0.0 }
 0x2ef   : > { %636 = vadd.xlane.f32.xlu1 %v635_v20 }
 0x37c   : > { %v637_v23 = vpop.xlane.xlu1 %636 }
 0x37d   : > { %v638_v24 = vadd.f32 %v637_v23, %v562_v22 }
 0x37f   : > { %640 = vst.msk [vmem:[#allocation3] sm:$0xff] %vm291_vm0, %v638_v24 }
 0x386   : > { %v727_v25 = vld [vmem:[#allocation3] sm:$0xff] }
 0x387   : > { %1024 = vrcp.f32 %v727_v25 }
 0x391   : > { %v1025_v49 = vpop.eup %1024 }
 0x392   : > { %v729_v26 = vmul.f32 %v1025_v49, %v727_v25 }
 0x394   : > { %v730_v27 = vsub.f32 2.0, %v729_v26 }
 0x396   : > { %v731_v28 = vmul.f32 %v1025_v49, %v730_v27 }
 0x398   : > { %735 = vperm.xlu0 %988, %v731_v28  }
 0x3c1   : > { %v717_v29 = vpop.f32.mrb[0].mxu0 }
 0x3c2   : > { %v909_v30 = vpop.f32.mrb[1].mxu0  ;;  %v721_v33 = vadd.f32 %v717_v29, %v647_v32 }
 0x417   : > { %v736_v34 = vpop.permute.xlu0 %735 }
 0x418   : > { %v738_v35 = vmul.f32 %v736_v34, %v721_v33 }
 0x41a   : > { %739 = vst [vmem:[%s286_s7] sm:$0xff] %v738_v35 }
 0x41b   : > { %1129 = shalt.err (!%p1126_p13)
}
 0x41c   : > { %s1130_s29 = scalar_lea.hbm %s1531_s9, 128  ;;  %s1134_s21 = scalar_lea.hbm %s1583_s3, 256 }
 0x41d   : > { %p1131_p11 = scmp.ne.s32.totalorder %s1531_s9, %s1130_s29  ;;  %p1135_p7 = scmp.lt.u32.totalorder %s1531_s9, %s1583_s3 }
 0x41e   : > { %p1136_p3 = scmp.lt.u32.totalorder %s1134_s21, %s1130_s29  ;;  %p1138_p4 = scmp.lt.u32.totalorder %s1130_s29, %s1531_s9 }
 0x41f   : > { %p1132_p2 = pnand %p1131_p11, %p1606_p10 }
 0x420   : > { %p1137_p0 = por %p1136_p3, %p1135_p7 }
 0x421   : > { %p1133_p5 = pneg %p1132_p2 }
 0x422   : > { %p1139_p12 = por %p1138_p4, %p1137_p0 }
 0x424   : > { %p1140_p1 = pnand %p1139_p12, %p1133_p5 }
 0x426   : > { %1143 = shalt.err (!%p1140_p1)
}
 0x427   : > { %916 = dma.vmem_to_hbm [thread:$0]  (%p1606_p10), %s1533_s20, 128, %s1531_s9, %s741_s22  }
 0x428 PF: > { %s767_s16 = sand.u32 1, %s1182_s12   ;;  %p1607_p8 = scmp.ne.s32.totalorder %s1596_s27, 0 }
 0x429   : > { %p1608_p9 = scmp.ge.s32.totalorder %s1202_s17, 2  ;;  %s768_s4 = scalar_lea.sflag [#allocation7], %s767_s16 }
 0x42b   : > { %p929_p6 = pnand %p1608_p9, %p1607_p8 }
 0x42d   : > { %1177 = dma.done.wait (!%p929_p6), %s768_s4, 128  }
 0x42e   : > { %1179 = vsyncadd (!%p929_p6), %s768_s4, 4294967168  ;;  %s22_s17 = sadd.s32 1, %s1202_s17   ;;  %s1609_s25 = sld [smem:[#allocation17_spill]] }
 0x42f   : > { %p19_p13 = scmp.ge.s32.totalorder %s22_s17, 4   ;;  %s1610_s15 = sld [smem:[#allocation15_spill]] }
 0x430   : > { %s1611_s16 = sld [smem:[#allocation16_spill]]  ;;  %s1612_s12 = smov %s1186_s13 }
 0x431   : > { %s1613_s13 = smov %s1190_s14  ;;  %21 = sbr.rel (!%p19_p13) target bundleno = 10 (0xa), region = 109 }
 0x434   : > { %s1614_s14 = smov %s1609_s25 }
 0x438   :  { %773 = vsyncpa [#allocation6], 1 }
 0x439   :  { %775 = vsyncpa [#allocation6 + $0x1], 1 }
 0x43a   :  { %776 = vsyncpa [#allocation9], 1 }
 0x43b   :  { %778 = vsyncpa [#allocation9 + $0x1], 1 }
 0x43c   :  { %779 = vsyncpa [#allocation7], 1 }
 0x43d   :  { %781 = vsyncpa [#allocation7 + $0x1], 1 }

</bundles_post_ra>
